<compile_context>
chip_gen: v6e
topology: v6e:2x2x1
jax: 0.10.0
libtpu: 0.0.40
codegen_flags: <defaults>
</compile_context>

<pallas_src>
import math

import jax
import jax.numpy as jnp
from jax.experimental import pallas as pl
from jax.experimental.pallas import tpu as pltpu


def get_kernel_size(channel):
    k = int(abs((math.log2(channel) + 1) / 2))
    return k if k % 2 else k + 1


def _make_eca_band_matrix(eca_w, C):
    """Banded (C, C) A with A @ y == Conv1d(1, 1, k, pad=(k-1)//2, bias=False)(y)."""
    k = eca_w.shape[0]
    pad = (k - 1) // 2
    ci = jnp.arange(C)[:, None]
    cj = jnp.arange(C)[None, :]
    idx = cj - ci + pad
    valid = (idx >= 0) & (idx < k)
    return jnp.where(valid, eca_w[jnp.clip(idx, 0, k - 1)], 0.0).astype(jnp.float32)


def _valid_offsets(dilations, kernel_size, T):
    """Unique time offsets of all depthwise taps that can touch real data."""
    offs = set()
    for d in dilations:
        pad = (kernel_size - 1) * d // 2
        for k in range(kernel_size):
            off = k * d - pad
            if abs(off) < T:
                offs.add(off)
    return sorted(offs)


def _plan_lanes(N, T, max_chunk=1024, split_threshold=1024):
    """Pick (padded_lanes, chunk, n_chunks).

    chunk is a multiple of lcm(128, T) (lane-dense AND sample-aligned), capped
    at ~max_chunk so the per-step VMEM footprint is bounded (v7x: 64 MiB);
    n_chunks grows with the batch and is >= 2 once there is enough work to
    feed both v7x TensorCores.  Tiny sizes run as a single fat step.
    """
    lanes = N * T
    block = (128 * T) // math.gcd(128, T)          # lcm(128, T)
    padded0 = -(-max(lanes, 1) // block) * block
    cap = max((max_chunk // block) * block, block)
    if padded0 <= cap:
        if padded0 >= split_threshold and (padded0 // 2) % block == 0:
            return padded0, padded0 // 2, 2
        return padded0, padded0, 1
    chunk = cap
    n_chunks = -(-lanes // chunk)
    return n_chunks * chunk, chunk, n_chunks


def init_layer_params(key, C_in, C_out, dilations, kernel_size, T, offsets, has_res):
    """Torch-style random weights, pre-folded for the fused kernel.

    Exact fold for eval-mode BN:
        bn(pw(dw(x))) = sum_off W_off @ shift_off(x) + bias
    with W_off[o, c] = bn_s*pw_w[b,o,c] * dw_w[b,c,k] for the (b,k) taps whose
    dilated offset equals `off`, and
        bias = bn_s*(pw_w @ dw_b + pw_b) + bn_t.
    The layer-0 residual 1x1 conv is appended as extra rows aligned with the
    offset-0 column block so it rides the same MXU push.
    """
    nb = len(dilations)
    cb = C_out // nb
    n_off = len(offsets)
    off_index = {o: j for j, o in enumerate(offsets)}
    ks = jax.random.split(key, 11)

    dw_w = 0.1 * jax.random.normal(ks[0], (nb, C_in, kernel_size), jnp.float32)
    dw_b = 0.1 * jax.random.normal(ks[1], (nb, C_in), jnp.float32)
    pw_w = 0.1 * jax.random.normal(ks[2], (nb, cb, C_in), jnp.float32)
    pw_b = 0.1 * jax.random.normal(ks[3], (nb, cb), jnp.float32)

    gamma = 1.0 + 0.1 * jax.random.normal(ks[4], (nb, cb), jnp.float32)
    beta = 0.1 * jax.random.normal(ks[5], (nb, cb), jnp.float32)
    r_mean = 0.1 * jax.random.normal(ks[6], (nb, cb), jnp.float32)
    r_var = 0.5 + jnp.abs(jax.random.normal(ks[7], (nb, cb), jnp.float32))
    eps = 1e-5
    # TODO(synk): BatchNorm1d is folded in eval mode (running stats); train-mode
    # batch statistics are not reproduced.
    bn_s = gamma / jnp.sqrt(r_var + eps)           # (nb, cb)
    bn_t = beta - r_mean * bn_s

    pw_w_eff = bn_s[:, :, None] * pw_w                                       # (nb, cb, C_in)
    pw_b_eff = bn_s * (jnp.einsum('boc,bc->bo', pw_w, dw_b) + pw_b) + bn_t   # (nb, cb)

    # Fold all depthwise taps into the per-offset block weight (C_out, n_off*C_in).
    W_big = jnp.zeros((C_out, n_off * C_in), jnp.float32)
    for b, d in enumerate(dilations):
        pad = (kernel_size - 1) * d // 2
        for k in range(kernel_size):
            off = k * d - pad
            if off not in off_index:               # tap lies fully in zero padding
                continue
            j = off_index[off]
            blk = pw_w_eff[b] * dw_w[b, :, k][None, :]                       # (cb, C_in)
            W_big = W_big.at[b * cb:(b + 1) * cb, j * C_in:(j + 1) * C_in].add(blk)
    bias = pw_b_eff.reshape(C_out, 1)

    k_eca = get_kernel_size(C_out)
    eca_w = 0.5 * jax.random.normal(ks[8], (k_eca,), jnp.float32)
    eca_A = _make_eca_band_matrix(eca_w, C_out)

    if has_res:   # torch residual_conv (1x1 conv) when C_in != C_out
        assert 0 in off_index
        res_w = 0.1 * jax.random.normal(ks[9], (C_out, C_in), jnp.float32)
        res_b = 0.1 * jax.random.normal(ks[10], (C_out, 1), jnp.float32)
        W_res = jnp.zeros((C_out, n_off * C_in), jnp.float32)
        j0 = off_index[0]
        W_res = W_res.at[:, j0 * C_in:(j0 + 1) * C_in].set(res_w)
        W_cat = jnp.concatenate([W_big, W_res], axis=0)        # (2*C_out, n_off*C_in)
        b_cat = jnp.concatenate([bias, res_b], axis=0)         # (2*C_out, 1)
    else:
        W_cat, b_cat = W_big, bias

    return {"w": W_cat, "b": b_cat, "eca_A": eca_A}


def make_temporal_encoding_call(layer_cfgs, C_out, T, offsets, chunk, n_chunks):
    """Build the fused pallas_call.  layer_cfgs: [(C_in, has_residual_conv), ...]."""
    n_off = len(offsets)
    lanes = chunk * n_chunks
    S = chunk // T                                  # samples per lane chunk

    def kernel(*refs):
        x_ref, mask_ref, pool_ref, bcast_ref = refs[0], refs[1], refs[2], refs[3]
        o_ref = refs[-1]
        pos = 4

        # Per-offset validity masks, hoisted: shared by every layer and branch.
        masks = [mask_ref[j:j + 1, :] for j in range(n_off)]   # each (1, chunk) f32

        h = x_ref[...]                               # (C_in0, chunk) f32
        for (c_in, has_res) in layer_cfgs:
            w_ref, b_ref, eca_ref = refs[pos:pos + 3]
            pos += 3

            # --- unique shifted (+masked) copies of h: rolls on the XLU ---
            shifted = []
            for j, off in enumerate(offsets):
                if off == 0:
                    shifted.append(h)                # residual block also reads this
                else:
                    rolled = pltpu.roll(h, shift=(-off) % chunk, axis=1)
                    shifted.append(masks[j] * rolled)
            Y = jnp.concatenate(shifted, axis=0)     # (n_off*c_in, chunk)

            # --- one MXU push: depthwise taps + pointwise + dw bias + BN
            #     (+ residual 1x1 conv rows for layer 0) ---
            zfull = jnp.dot(w_ref[...], Y,
                            preferred_element_type=jnp.float32) + b_ref[...]
            z = zfull[:C_out]                        # (C_out, chunk)
            res = zfull[C_out:2 * C_out] if has_res else h
            concat = jnp.maximum(z, 0.0)             # ReLU, post-BN

            # --- ECA: thin pooling matmul -> banded channel conv on (C_out, S)
            #     means -> sigmoid -> 0/1 broadcast matmul back over time ---
            means = jnp.dot(concat, pool_ref[...],
                            preferred_element_type=jnp.float32)          # (C_out, S)
            gate_s = jax.nn.sigmoid(
                jnp.dot(eca_ref[...], means, preferred_element_type=jnp.float32))
            gate = jnp.dot(gate_s, bcast_ref[...],
                           preferred_element_type=jnp.float32)           # (C_out, chunk)

            h = concat * gate + res
        o_ref[...] = h

    c_in0 = layer_cfgs[0][0]
    in_specs = [
        pl.BlockSpec((c_in0, chunk), lambda i: (0, i)),       # x slab (chunked on lanes)
        pl.BlockSpec((n_off, chunk), lambda i: (0, 0)),       # per-offset validity masks
        pl.BlockSpec((chunk, S), lambda i: (0, 0)),           # time-mean pooling matrix
        pl.BlockSpec((S, chunk), lambda i: (0, 0)),           # gate broadcast matrix
    ]
    for (c_in, has_res) in layer_cfgs:
        R = 2 * C_out if has_res else C_out
        in_specs += [
            pl.BlockSpec((R, n_off * c_in), lambda i: (0, 0)),
            pl.BlockSpec((R, 1), lambda i: (0, 0)),
            pl.BlockSpec((C_out, C_out), lambda i: (0, 0)),
        ]

    grid_spec = pltpu.PrefetchScalarGridSpec(
        num_scalar_prefetch=0,
        grid=(n_chunks,),
        in_specs=in_specs,
        out_specs=pl.BlockSpec((C_out, chunk), lambda i: (0, i)),
    )
    return pl.pallas_call(
        kernel,
        out_shape=jax.ShapeDtypeStruct((C_out, lanes), jnp.float32),
        grid_spec=grid_spec,
        compiler_params=pltpu.CompilerParams(
            dimension_semantics=("parallel",),
            vmem_limit_bytes=64 * 1024 * 1024),
    )


def temporal_encoding(x, call, layer_params, C_out, T, offsets, chunk, n_chunks):
    B, T_, H, D = x.shape
    assert T_ == T
    N = B * H
    lanes = chunk * n_chunks

    # torch: x.view(B * num_hands, D_total, T) -- raw row-major reinterpret of
    # the contiguous (B, T, H, D) tensor (no permute in the reference).
    h = jnp.reshape(x, (N, D, T))
    # kernel layout: channels on sublanes, sample-major time on lanes; pad the
    # lane axis up to the lane-dense, chunk-aligned width.
    xs = jnp.transpose(h, (1, 0, 2)).reshape(D, N * T)
    xs = jnp.pad(xs, ((0, 0), (0, lanes - N * T)))

    # Hoisted per-offset validity masks (identical for every chunk because
    # chunk % T == 0 keeps sample blocks chunk-aligned).
    t_local = jnp.arange(chunk, dtype=jnp.int32) % T
    masks = jnp.stack(
        [((t_local + off >= 0) & (t_local + off < T)).astype(jnp.float32)
         for off in offsets], axis=0)                         # (n_off, chunk)

    # Thin ECA pooling / broadcast matrices.
    S = chunk // T
    sample_id = jnp.arange(chunk, dtype=jnp.int32) // T
    pool = (sample_id[:, None] == jnp.arange(S)[None, :]).astype(jnp.float32) / T
    bcast = (jnp.arange(S)[:, None] == sample_id[None, :]).astype(jnp.float32)

    args = [xs, masks, pool, bcast]
    for p in layer_params:
        args += [p["w"], p["b"], p["eca_A"]]

    out = call(*args)                                   # (C_out, lanes)
    out = out[:, :N * T].reshape(C_out, B, H, T)        # drop padded tail lanes
    # torch: x.view(B, num_hands, -1, T).permute(0, 3, 1, 2) -> (B, T, H, C_out)
    return jnp.transpose(out, (1, 3, 2, 0))


if __name__ == "__main__":
    B, T, H, D = 2, 8, 2, 16        # batch, seq, num_hands, D_total (= in_channels)
    C_out = 32
    dilations = (1, 2, 4, 8)
    kernel_size = 3
    num_layers = 2
    N = B * H

    x = jax.random.normal(jax.random.PRNGKey(0), (B, T, H, D), jnp.float32)

    offsets = _valid_offsets(dilations, kernel_size, T)
    lanes, chunk, n_chunks = _plan_lanes(N, T)

    layer_cfgs = []
    c_in = D
    for _ in range(num_layers):
        layer_cfgs.append((c_in, c_in != C_out))
        c_in = C_out

    keys = jax.random.split(jax.random.PRNGKey(1), num_layers)
    layer_params = [
        init_layer_params(k, cfg[0], C_out, dilations, kernel_size, T, offsets, cfg[1])
        for k, cfg in zip(keys, layer_cfgs)
    ]

    call = make_temporal_encoding_call(layer_cfgs, C_out, T, offsets, chunk, n_chunks)
    out = temporal_encoding(x, call, layer_params, C_out, T, offsets, chunk, n_chunks)
    out = jax.block_until_ready(out)
    assert out.shape == (B, T, H, C_out), out.shape
    assert out.dtype == jnp.float32
    print("KERNEL_OK")
</pallas_src>

<mosaic_0001>
module attributes {stable_mosaic.version = 11 : i64} {
  func.func @kernel(%arg0: i32, %arg1: memref<16x128xf32, #tpu.memory_space<vmem>>, %arg2: memref<7x128xf32, #tpu.memory_space<vmem>>, %arg3: memref<128x16xf32, #tpu.memory_space<vmem>>, %arg4: memref<16x128xf32, #tpu.memory_space<vmem>>, %arg5: memref<64x112xf32, #tpu.memory_space<vmem>>, %arg6: memref<64x1xf32, #tpu.memory_space<vmem>>, %arg7: memref<32x32xf32, #tpu.memory_space<vmem>>, %arg8: memref<32x224xf32, #tpu.memory_space<vmem>>, %arg9: memref<32x1xf32, #tpu.memory_space<vmem>>, %arg10: memref<32x32xf32, #tpu.memory_space<vmem>>, %arg11: memref<32x128xf32, #tpu.memory_space<vmem>>) attributes {dimension_semantics = [#tpu.dimension_semantics<parallel>], iteration_bounds = array<i64: 1>, scalar_prefetch = 0 : i64, scratch_operands = 0 : i64, tpu.core_type = #tpu.core_type<tc>, window_params = [{transform_indices = @transform_0, window_bounds = array<i64: 16, 128>}, {pipeline_mode = #tpu.pipeline_mode<synchronous>, transform_indices = @transform_1, window_bounds = array<i64: 7, 128>}, {pipeline_mode = #tpu.pipeline_mode<synchronous>, transform_indices = @transform_2, window_bounds = array<i64: 128, 16>}, {pipeline_mode = #tpu.pipeline_mode<synchronous>, transform_indices = @transform_3, window_bounds = array<i64: 16, 128>}, {pipeline_mode = #tpu.pipeline_mode<synchronous>, transform_indices = @transform_4, window_bounds = array<i64: 64, 112>}, {pipeline_mode = #tpu.pipeline_mode<synchronous>, transform_indices = @transform_5, window_bounds = array<i64: 64, 1>}, {pipeline_mode = #tpu.pipeline_mode<synchronous>, transform_indices = @transform_6, window_bounds = array<i64: 32, 32>}, {pipeline_mode = #tpu.pipeline_mode<synchronous>, transform_indices = @transform_7, window_bounds = array<i64: 32, 224>}, {pipeline_mode = #tpu.pipeline_mode<synchronous>, transform_indices = @transform_8, window_bounds = array<i64: 32, 1>}, {pipeline_mode = #tpu.pipeline_mode<synchronous>, transform_indices = @transform_9, window_bounds = array<i64: 32, 32>}, {transform_indices = @transform_10, window_bounds = array<i64: 32, 128>}]} {
    %c0 = arith.constant 0 : index
    %c0_0 = arith.constant 0 : index
    %0 = vector.load %arg2[%c0, %c0_0] : memref<7x128xf32, #tpu.memory_space<vmem>>, vector<1x128xf32>
    %c1 = arith.constant 1 : index
    %c0_1 = arith.constant 0 : index
    %1 = vector.load %arg2[%c1, %c0_1] : memref<7x128xf32, #tpu.memory_space<vmem>>, vector<1x128xf32>
    %c2 = arith.constant 2 : index
    %c0_2 = arith.constant 0 : index
    %2 = vector.load %arg2[%c2, %c0_2] : memref<7x128xf32, #tpu.memory_space<vmem>>, vector<1x128xf32>
    %c4 = arith.constant 4 : index
    %c0_3 = arith.constant 0 : index
    %3 = vector.load %arg2[%c4, %c0_3] : memref<7x128xf32, #tpu.memory_space<vmem>>, vector<1x128xf32>
    %c5 = arith.constant 5 : index
    %c0_4 = arith.constant 0 : index
    %4 = vector.load %arg2[%c5, %c0_4] : memref<7x128xf32, #tpu.memory_space<vmem>>, vector<1x128xf32>
    %c6 = arith.constant 6 : index
    %c0_5 = arith.constant 0 : index
    %5 = vector.load %arg2[%c6, %c0_5] : memref<7x128xf32, #tpu.memory_space<vmem>>, vector<1x128xf32>
    %c0_6 = arith.constant 0 : index
    %c0_7 = arith.constant 0 : index
    %6 = vector.load %arg1[%c0_6, %c0_7] : memref<16x128xf32, #tpu.memory_space<vmem>>, vector<16x128xf32>
    %c4_i32 = arith.constant 4 : i32
    %7 = tpu.dynamic_rotate %6 by %c4_i32 dim 1 : vector<16x128xf32>, i32 -> vector<16x128xf32>
    %8 = vector.broadcast %0 : vector<1x128xf32> to vector<16x128xf32>
    %9 = arith.mulf %8, %7 : vector<16x128xf32>
    %c2_i32 = arith.constant 2 : i32
    %10 = tpu.dynamic_rotate %6 by %c2_i32 dim 1 : vector<16x128xf32>, i32 -> vector<16x128xf32>
    %11 = vector.broadcast %1 : vector<1x128xf32> to vector<16x128xf32>
    %12 = arith.mulf %11, %10 : vector<16x128xf32>
    %c1_i32 = arith.constant 1 : i32
    %13 = tpu.dynamic_rotate %6 by %c1_i32 dim 1 : vector<16x128xf32>, i32 -> vector<16x128xf32>
    %14 = vector.broadcast %2 : vector<1x128xf32> to vector<16x128xf32>
    %15 = arith.mulf %14, %13 : vector<16x128xf32>
    %c127_i32 = arith.constant 127 : i32
    %16 = tpu.dynamic_rotate %6 by %c127_i32 dim 1 : vector<16x128xf32>, i32 -> vector<16x128xf32>
    %17 = vector.broadcast %3 : vector<1x128xf32> to vector<16x128xf32>
    %18 = arith.mulf %17, %16 : vector<16x128xf32>
    %c126_i32 = arith.constant 126 : i32
    %19 = tpu.dynamic_rotate %6 by %c126_i32 dim 1 : vector<16x128xf32>, i32 -> vector<16x128xf32>
    %20 = vector.broadcast %4 : vector<1x128xf32> to vector<16x128xf32>
    %21 = arith.mulf %20, %19 : vector<16x128xf32>
    %c124_i32 = arith.constant 124 : i32
    %22 = tpu.dynamic_rotate %6 by %c124_i32 dim 1 : vector<16x128xf32>, i32 -> vector<16x128xf32>
    %23 = vector.broadcast %5 : vector<1x128xf32> to vector<16x128xf32>
    %24 = arith.mulf %23, %22 : vector<16x128xf32>
    %25 = tpu.concatenate %9, %12, %15, %6, %18, %21, %24 in 0 : vector<16x128xf32>, vector<16x128xf32>, vector<16x128xf32>, vector<16x128xf32>, vector<16x128xf32>, vector<16x128xf32>, vector<16x128xf32> -> vector<112x128xf32>
    %c0_8 = arith.constant 0 : index
    %c0_9 = arith.constant 0 : index
    %26 = vector.load %arg5[%c0_8, %c0_9] : memref<64x112xf32, #tpu.memory_space<vmem>>, vector<64x112xf32>
    %cst = arith.constant dense<0.000000e+00> : vector<64x128xf32>
    %27 = tpu.matmul %26, %25, %cst {dimension_numbers = #tpu.dot_dimension_numbers<[1], [0], [0], [1], [0, 0, 1, 1], [], []>} : vector<64x112xf32>, vector<112x128xf32>, vector<64x128xf32> -> vector<64x128xf32>
    %c0_10 = arith.constant 0 : index
    %c0_11 = arith.constant 0 : index
    %28 = vector.load %arg6[%c0_10, %c0_11] : memref<64x1xf32, #tpu.memory_space<vmem>>, vector<64x1xf32>
    %29 = vector.broadcast %28 : vector<64x1xf32> to vector<64x128xf32>
    %30 = arith.addf %27, %29 : vector<64x128xf32>
    %31 = vector.extract_strided_slice %30 {offsets = [0, 0], sizes = [32, 128], strides = [1, 1]} : vector<64x128xf32> to vector<32x128xf32>
    %32 = vector.extract_strided_slice %30 {offsets = [32, 0], sizes = [32, 128], strides = [1, 1]} : vector<64x128xf32> to vector<32x128xf32>
    %cst_12 = arith.constant 0.000000e+00 : f32
    %33 = vector.broadcast %cst_12 : f32 to vector<32x128xf32>
    %34 = arith.maximumf %31, %33 : vector<32x128xf32>
    %c0_13 = arith.constant 0 : index
    %c0_14 = arith.constant 0 : index
    %35 = vector.load %arg3[%c0_13, %c0_14] : memref<128x16xf32, #tpu.memory_space<vmem>>, vector<128x16xf32>
    %cst_15 = arith.constant dense<0.000000e+00> : vector<32x16xf32>
    %36 = tpu.matmul %34, %35, %cst_15 {dimension_numbers = #tpu.dot_dimension_numbers<[1], [0], [0], [1], [0, 0, 1, 1], [], []>} : vector<32x128xf32>, vector<128x16xf32>, vector<32x16xf32> -> vector<32x16xf32>
    %c0_16 = arith.constant 0 : index
    %c0_17 = arith.constant 0 : index
    %37 = vector.load %arg7[%c0_16, %c0_17] : memref<32x32xf32, #tpu.memory_space<vmem>>, vector<32x32xf32>
    %cst_18 = arith.constant dense<0.000000e+00> : vector<32x16xf32>
    %38 = tpu.matmul %37, %36, %cst_18 {dimension_numbers = #tpu.dot_dimension_numbers<[1], [0], [0], [1], [0, 0, 1, 1], [], []>} : vector<32x32xf32>, vector<32x16xf32>, vector<32x16xf32> -> vector<32x16xf32>
    %39 = arith.negf %38 : vector<32x16xf32>
    %40 = math.exp %39 : vector<32x16xf32>
    %cst_19 = arith.constant 1.000000e+00 : f32
    %41 = vector.broadcast %cst_19 : f32 to vector<32x16xf32>
    %42 = arith.addf %41, %40 : vector<32x16xf32>
    %43 = arith.divf %41, %42 : vector<32x16xf32>
    %c0_20 = arith.constant 0 : index
    %c0_21 = arith.constant 0 : index
    %44 = vector.load %arg4[%c0_20, %c0_21] : memref<16x128xf32, #tpu.memory_space<vmem>>, vector<16x128xf32>
    %cst_22 = arith.constant dense<0.000000e+00> : vector<32x128xf32>
    %45 = tpu.matmul %43, %44, %cst_22 {dimension_numbers = #tpu.dot_dimension_numbers<[1], [0], [0], [1], [0, 0, 1, 1], [], []>} : vector<32x16xf32>, vector<16x128xf32>, vector<32x128xf32> -> vector<32x128xf32>
    %46 = arith.mulf %34, %45 : vector<32x128xf32>
    %47 = arith.addf %46, %32 : vector<32x128xf32>
    %c4_i32_23 = arith.constant 4 : i32
    %48 = tpu.dynamic_rotate %47 by %c4_i32_23 dim 1 : vector<32x128xf32>, i32 -> vector<32x128xf32>
    %49 = vector.broadcast %0 : vector<1x128xf32> to vector<32x128xf32>
    %50 = arith.mulf %49, %48 : vector<32x128xf32>
    %c2_i32_24 = arith.constant 2 : i32
    %51 = tpu.dynamic_rotate %47 by %c2_i32_24 dim 1 : vector<32x128xf32>, i32 -> vector<32x128xf32>
    %52 = vector.broadcast %1 : vector<1x128xf32> to vector<32x128xf32>
    %53 = arith.mulf %52, %51 : vector<32x128xf32>
    %c1_i32_25 = arith.constant 1 : i32
    %54 = tpu.dynamic_rotate %47 by %c1_i32_25 dim 1 : vector<32x128xf32>, i32 -> vector<32x128xf32>
    %55 = vector.broadcast %2 : vector<1x128xf32> to vector<32x128xf32>
    %56 = arith.mulf %55, %54 : vector<32x128xf32>
    %c127_i32_26 = arith.constant 127 : i32
    %57 = tpu.dynamic_rotate %47 by %c127_i32_26 dim 1 : vector<32x128xf32>, i32 -> vector<32x128xf32>
    %58 = vector.broadcast %3 : vector<1x128xf32> to vector<32x128xf32>
    %59 = arith.mulf %58, %57 : vector<32x128xf32>
    %c126_i32_27 = arith.constant 126 : i32
    %60 = tpu.dynamic_rotate %47 by %c126_i32_27 dim 1 : vector<32x128xf32>, i32 -> vector<32x128xf32>
    %61 = vector.broadcast %4 : vector<1x128xf32> to vector<32x128xf32>
    %62 = arith.mulf %61, %60 : vector<32x128xf32>
    %c124_i32_28 = arith.constant 124 : i32
    %63 = tpu.dynamic_rotate %47 by %c124_i32_28 dim 1 : vector<32x128xf32>, i32 -> vector<32x128xf32>
    %64 = vector.broadcast %5 : vector<1x128xf32> to vector<32x128xf32>
    %65 = arith.mulf %64, %63 : vector<32x128xf32>
    %66 = tpu.concatenate %50, %53, %56, %47, %59, %62, %65 in 0 : vector<32x128xf32>, vector<32x128xf32>, vector<32x128xf32>, vector<32x128xf32>, vector<32x128xf32>, vector<32x128xf32>, vector<32x128xf32> -> vector<224x128xf32>
    %c0_29 = arith.constant 0 : index
    %c0_30 = arith.constant 0 : index
    %67 = vector.load %arg8[%c0_29, %c0_30] : memref<32x224xf32, #tpu.memory_space<vmem>>, vector<32x224xf32>
    %cst_31 = arith.constant dense<0.000000e+00> : vector<32x128xf32>
    %68 = tpu.matmul %67, %66, %cst_31 {dimension_numbers = #tpu.dot_dimension_numbers<[1], [0], [0], [1], [0, 0, 1, 1], [], []>} : vector<32x224xf32>, vector<224x128xf32>, vector<32x128xf32> -> vector<32x128xf32>
    %c0_32 = arith.constant 0 : index
    %c0_33 = arith.constant 0 : index
    %69 = vector.load %arg9[%c0_32, %c0_33] : memref<32x1xf32, #tpu.memory_space<vmem>>, vector<32x1xf32>
    %70 = vector.broadcast %69 : vector<32x1xf32> to vector<32x128xf32>
    %71 = arith.addf %68, %70 : vector<32x128xf32>
    %cst_34 = arith.constant 0.000000e+00 : f32
    %72 = vector.broadcast %cst_34 : f32 to vector<32x128xf32>
    %73 = arith.maximumf %71, %72 : vector<32x128xf32>
    %c0_35 = arith.constant 0 : index
    %c0_36 = arith.constant 0 : index
    %74 = vector.load %arg3[%c0_35, %c0_36] : memref<128x16xf32, #tpu.memory_space<vmem>>, vector<128x16xf32>
    %cst_37 = arith.constant dense<0.000000e+00> : vector<32x16xf32>
    %75 = tpu.matmul %73, %74, %cst_37 {dimension_numbers = #tpu.dot_dimension_numbers<[1], [0], [0], [1], [0, 0, 1, 1], [], []>} : vector<32x128xf32>, vector<128x16xf32>, vector<32x16xf32> -> vector<32x16xf32>
    %c0_38 = arith.constant 0 : index
    %c0_39 = arith.constant 0 : index
    %76 = vector.load %arg10[%c0_38, %c0_39] : memref<32x32xf32, #tpu.memory_space<vmem>>, vector<32x32xf32>
    %cst_40 = arith.constant dense<0.000000e+00> : vector<32x16xf32>
    %77 = tpu.matmul %76, %75, %cst_40 {dimension_numbers = #tpu.dot_dimension_numbers<[1], [0], [0], [1], [0, 0, 1, 1], [], []>} : vector<32x32xf32>, vector<32x16xf32>, vector<32x16xf32> -> vector<32x16xf32>
    %78 = arith.negf %77 : vector<32x16xf32>
    %79 = math.exp %78 : vector<32x16xf32>
    %cst_41 = arith.constant 1.000000e+00 : f32
    %80 = vector.broadcast %cst_41 : f32 to vector<32x16xf32>
    %81 = arith.addf %80, %79 : vector<32x16xf32>
    %82 = arith.divf %80, %81 : vector<32x16xf32>
    %c0_42 = arith.constant 0 : index
    %c0_43 = arith.constant 0 : index
    %83 = vector.load %arg4[%c0_42, %c0_43] : memref<16x128xf32, #tpu.memory_space<vmem>>, vector<16x128xf32>
    %cst_44 = arith.constant dense<0.000000e+00> : vector<32x128xf32>
    %84 = tpu.matmul %82, %83, %cst_44 {dimension_numbers = #tpu.dot_dimension_numbers<[1], [0], [0], [1], [0, 0, 1, 1], [], []>} : vector<32x16xf32>, vector<16x128xf32>, vector<32x128xf32> -> vector<32x128xf32>
    %85 = arith.mulf %73, %84 : vector<32x128xf32>
    %86 = arith.addf %85, %47 : vector<32x128xf32>
    %c0_45 = arith.constant 0 : index
    %c0_46 = arith.constant 0 : index
    %87 = vector.load %arg11[%c0_45, %c0_46] : memref<32x128xf32, #tpu.memory_space<vmem>>, vector<32x128xf32>
    tpu.vector_store %arg11[%c0_45, %c0_46], %86 {strides = array<i32>} : memref<32x128xf32, #tpu.memory_space<vmem>>, vector<32x128xf32>,
    return
  }
  func.func @transform_0(%arg0: i32) -> (i32, i32) {
    %c0_i32 = arith.constant 0 : i32
    %c0_i32_0 = arith.constant 0 : i32
    return %c0_i32, %arg0 : i32, i32
  }
  func.func @transform_1(%arg0: i32) -> (i32, i32) {
    %c0_i32 = arith.constant 0 : i32
    %c0_i32_0 = arith.constant 0 : i32
    %c0_i32_1 = arith.constant 0 : i32
    return %c0_i32, %c0_i32_0 : i32, i32
  }
  func.func @transform_2(%arg0: i32) -> (i32, i32) {
    %c0_i32 = arith.constant 0 : i32
    %c0_i32_0 = arith.constant 0 : i32
    %c0_i32_1 = arith.constant 0 : i32
    return %c0_i32, %c0_i32_0 : i32, i32
  }
  func.func @transform_3(%arg0: i32) -> (i32, i32) {
    %c0_i32 = arith.constant 0 : i32
    %c0_i32_0 = arith.constant 0 : i32
    %c0_i32_1 = arith.constant 0 : i32
    return %c0_i32, %c0_i32_0 : i32, i32
  }
  func.func @transform_4(%arg0: i32) -> (i32, i32) {
    %c0_i32 = arith.constant 0 : i32
    %c0_i32_0 = arith.constant 0 : i32
    %c0_i32_1 = arith.constant 0 : i32
    return %c0_i32, %c0_i32_0 : i32, i32
  }
  func.func @transform_5(%arg0: i32) -> (i32, i32) {
    %c0_i32 = arith.constant 0 : i32
    %c0_i32_0 = arith.constant 0 : i32
    %c0_i32_1 = arith.constant 0 : i32
    return %c0_i32, %c0_i32_0 : i32, i32
  }
  func.func @transform_6(%arg0: i32) -> (i32, i32) {
    %c0_i32 = arith.constant 0 : i32
    %c0_i32_0 = arith.constant 0 : i32
    %c0_i32_1 = arith.constant 0 : i32
    return %c0_i32, %c0_i32_0 : i32, i32
  }
  func.func @transform_7(%arg0: i32) -> (i32, i32) {
    %c0_i32 = arith.constant 0 : i32
    %c0_i32_0 = arith.constant 0 : i32
    %c0_i32_1 = arith.constant 0 : i32
    return %c0_i32, %c0_i32_0 : i32, i32
  }
  func.func @transform_8(%arg0: i32) -> (i32, i32) {
    %c0_i32 = arith.constant 0 : i32
    %c0_i32_0 = arith.constant 0 : i32
    %c0_i32_1 = arith.constant 0 : i32
    return %c0_i32, %c0_i32_0 : i32, i32
  }
  func.func @transform_9(%arg0: i32) -> (i32, i32) {
    %c0_i32 = arith.constant 0 : i32
    %c0_i32_0 = arith.constant 0 : i32
    %c0_i32_1 = arith.constant 0 : i32
    return %c0_i32, %c0_i32_0 : i32, i32
  }
  func.func @transform_10(%arg0: i32) -> (i32, i32) {
    %c0_i32 = arith.constant 0 : i32
    %c0_i32_0 = arith.constant 0 : i32
    return %c0_i32, %arg0 : i32, i32
  }
}

</mosaic_0001>

<bundles_post_ra>
// kernel: tpu_custom_call.1
= control target key start
LH: loop header
LB: loop body
LE: loop exit
PB: predicated region body
PF: predicated region fallthrough
CT: control target
= control target key end

     0   :  { %15 = vsyncpa [#allocation3], 0  ;;  %s2186_s0 = inlined_call_operand.vmem [shape: f32[16,128], index: 0, kind: input, shape index: {}]   ;;  %s2187_s1 = inlined_call_operand.hbm [shape: f32[7,128], index: 1, kind: input, shape index: {}]   ;;  %s2188_s2 = inlined_call_operand.vmem [shape: f32[128,16], index: 2, kind: input, shape index: {}]   ;;  %s2189_s3 = inlined_call_operand.vmem [shape: f32[16,128], index: 3, kind: input, shape index: {}]   ;;  %s2190_s4 = inlined_call_operand.vmem [shape: f32[64,112], index: 4, kind: input, shape index: {}]   ;;  %s2191_s5 = inlined_call_operand.vmem [shape: f32[64,1], index: 5, kind: input, shape index: {}]   ;;  %s2192_s6 = inlined_call_operand.vmem [shape: f32[32,32], index: 6, kind: input, shape index: {}]   ;;  %s2193_s7 = inlined_call_operand.vmem [shape: f32[32,224], index: 7, kind: input, shape index: {}]   ;;  %s2194_s8 = inlined_call_operand.vmem [shape: f32[32,1], index: 8, kind: input, shape index: {}]   ;;  %s2195_s9 = inlined_call_operand.vmem [shape: f32[32,32], index: 9, kind: input, shape index: {}]   ;;  %s2196_s10 = inlined_call_operand.hbm [shape: f32[32,128], index: 10, kind: output, shape index: {}]  }
   0x1   :  { %16 = vsyncpa [#allocation4], 0  ;;  %s1569_s13 = smov [#allocation2]  }
   0x2   :  { %s25_s14 = sshll.u32 %s1569_s13, 4  ;;  %s26_s14 = int_to_ptr.vmem [resolvable:$true] %s25_s14 }
   0x3   :  { %s1533_s15 = scalar_lea.vmem %s26_s14, 128  ;;  %p1538_p1 = scmp.lt.s32.totalorder %s26_s14, %s26_s14 }
   0x4   :  { %p1534_p0 = scmp.ne.s32.totalorder %s26_s14, %s1533_s15  ;;  %p1539_p2 = scmp.lt.s32.totalorder %s1533_s15, %s1533_s15 }
   0x6   :  { %p1540_p3 = por %p1539_p2, %p1538_p1 }
   0x8   :  { %p1541_p4 = pnand %p1540_p3, %p1534_p0 }
   0xa   :  { %1544 = shalt.err (!%p1541_p4)
}
   0xb   :  { %28 = dma.hbm_to_vmem [thread:$0]  %s2187_s1, 128, %s26_s14, [#allocation3]  }
   0xc   :  { %1565 = dma.done.wait [#allocation3], 128  }
   0xd   :  { %1566 = vsyncadd [#allocation3], 4294967168  ;;  %v1642_v0 = vld [vmem:[%s2186_s0 + $0x8] sm:$0xff]  ;;  %s1570_s20 = smov 124   ;;  %s1571_s21 = smov 126   ;;  %v1651_v1 = vld [vmem:[%s2186_s0] sm:$0xff] }
   0xe   :  { %108 = vrot.lane.b32.xlu0 %v1642_v0, %s1570_s20  ;;  %98 = vrot.lane.b32.xlu1 %v1642_v0, %s1571_s21  ;;  %s1572_s1 = smov 127   ;;  %s1573_s24 = smov 1   ;;  %v116_v2 = vld [vmem:[%s2190_s4] sm:$0xff]  ;;  %vm172_vm0 = vcmask 916480   ;;  %v125_v3 = vld [vmem:[%s2191_s5 + $0x8] sm:$0xff]  ;;  %v1576_v5 = vmov 0  }
   0xf   :  { %s1574_s0 = smov 2   ;;  %1343 = vmatprep.mubr.msk.f32.mxu0 %vm172_vm0, %v116_v2  ;;  %s1575_s27 = smov 4   ;;  %v124_v4 = vld [vmem:[%s2191_s5] sm:$0xff]  ;;  %1492 = vset.pattern.permute.xlu1 %v1576_v5  ;;  %v1686_v6 = vld [vmem:[%s2188_s2 + $0x78] sm:$0xff]  ;;  %v126_v7 = vld [vmem:[%s2191_s5 + $0x10] sm:$0xff]  ;;  %vm411_vm1 = vcmask 261120  }
  0x10   :  { %1491 = vset.pattern.permute.xlu0 %v1576_v5  ;;  %v127_v8 = vld [vmem:[%s2191_s5 + $0x18] sm:$0xff]  ;;  %1355 = vmatprep.subr.mxu1 %v1686_v6  ;;  %v1698_v9 = vld [vmem:[%s2188_s2 + $0x70] sm:$0xff]  ;;  %v1705_v10 = vld [vmem:[%s2188_s2 + $0x68] sm:$0xff]  ;;  %vm535_vm2 = vcmask 130048   ;;  %vm745_vm3 = vcmask 785408  }
  0x11   :  { %1356 = vmatpush3.msra.mxu1 %v1686_v6  ;;  %v131_v11 = vld [vmem:[%s2191_s5 + $0x38] sm:$0xff]  ;;  %v130_v12 = vld [vmem:[%s2191_s5 + $0x30] sm:$0xff]  ;;  %v1718_v13 = vld [vmem:[%s2188_s2 + $0x60] sm:$0xff] }
  0x12   :  { %106 = vrot.lane.b32.xlu0 %v1651_v1, %s1570_s20  ;;  %96 = vrot.lane.b32.xlu1 %v1651_v1, %s1571_s21  ;;  %v1724_v14 = vld [vmem:[%s2188_s2 + $0x58] sm:$0xff]  ;;  %v129_v15 = vld [vmem:[%s2191_s5 + $0x28] sm:$0xff]  ;;  %v1785_v24 = vld [vmem:[#allocation2 + $0x6] ss:$0 sm:$0xff] }
  0x13   :  { %1357 = vmatprep.subr.mxu1 %v1698_v9  ;;  %v128_v16 = vld [vmem:[%s2191_s5 + $0x20] sm:$0xff]  ;;  %v1738_v17 = vld [vmem:[%s2188_s2 + $0x50] sm:$0xff]  ;;  %v1744_v18 = vld [vmem:[%s2188_s2 + $0x48] sm:$0xff] }
  0x14   :  { %1358 = vmatpush3.msra.mxu1 %v1698_v9  ;;  %v1751_v19 = vld [vmem:[%s2188_s2 + $0x40] sm:$0xff]  ;;  %v1758_v20 = vld [vmem:[%s2188_s2 + $0x38] sm:$0xff]  ;;  %v1765_v21 = vld [vmem:[%s2188_s2 + $0x30] sm:$0xff] }
  0x15   :  { %1359 = vmatprep.subr.mxu1 %v1705_v10  ;;  %v1772_v22 = vld [vmem:[%s2188_s2 + $0x28] sm:$0xff]  ;;  %v1779_v23 = vld [vmem:[%s2188_s2 + $0x20] sm:$0xff]  ;;  %v118_v55 = vld [vmem:[%s2190_s4 + $0x10] sm:$0xff] }
  0x16   :  { %88 = vrot.lane.b32.xlu0 %v1642_v0, %s1572_s1  ;;  %86 = vrot.lane.b32.xlu1 %v1651_v1, %s1572_s1  ;;  %v1788_v28 = vld [vmem:[#allocation2 + $0x5] ss:$0 sm:$0xff]  ;;  %v1791_v32 = vld [vmem:[#allocation2 + $0x4] ss:$0 sm:$0xff]  ;;  %v1797_v41 = vld [vmem:[#allocation2 + $0x2] ss:$0 sm:$0xff] }
  0x17   :  { %1360 = vmatpush3.msra.mxu1 %v1705_v10  ;;  %v1802_v44 = vld [vmem:[#allocation2 + $0x1] ss:$0 sm:$0xff]  ;;  %v1808_v49 = vld [vmem:[#allocation2] ss:$0 sm:$0xff]  ;;  %v117_v54 = vld [vmem:[%s2190_s4 + $0x8] sm:$0xff] }
  0x18   :  { %1361 = vmatprep.subr.mxu1 %v1718_v13  ;;  %v119_v56 = vld [vmem:[%s2190_s4 + $0x18] sm:$0xff]  ;;  %v120_v57 = vld [vmem:[%s2190_s4 + $0x20] sm:$0xff]  ;;  %v121_v58 = vld [vmem:[%s2190_s4 + $0x28] sm:$0xff] }
  0x19   :  { %1362 = vmatpush3.msra.mxu1 %v1718_v13  ;;  %v122_v59 = vld [vmem:[%s2190_s4 + $0x30] sm:$0xff]  ;;  %v123_v60 = vld [vmem:[%s2190_s4 + $0x38] sm:$0xff]  ;;  %v1858_v63 = vld [vmem:[%s2188_s2 + $0x8] sm:$0xff] }
  0x1a   :  { %78 = vrot.lane.b32.xlu0 %v1642_v0, %s1573_s24  ;;  %76 = vrot.lane.b32.xlu1 %v1651_v1, %s1573_s24  ;;  %v1844_v61 = vld [vmem:[%s2188_s2 + $0x18] sm:$0xff]  ;;  %v1851_v62 = vld [vmem:[%s2188_s2 + $0x10] sm:$0xff] }
  0x1b   :  { %1363 = vmatprep.subr.mxu1 %v1724_v14 }
  0x1c   :  { %1364 = vmatpush3.msra.mxu1 %v1724_v14 }
  0x1d   :  { %1365 = vmatprep.subr.mxu1 %v1738_v17 }
  0x1e   :  { %68 = vrot.lane.b32.xlu0 %v1642_v0, %s1574_s0  ;;  %66 = vrot.lane.b32.xlu1 %v1651_v1, %s1574_s0 }
  0x1f   :  { %1366 = vmatpush3.msra.mxu1 %v1738_v17 }
  0x20   :  { %1367 = vmatprep.subr.mxu1 %v1744_v18 }
  0x21   :  { %1368 = vmatpush3.msra.mxu1 %v1744_v18 }
  0x22   :  { %58 = vrot.lane.b32.xlu0 %v1642_v0, %s1575_s27  ;;  %56 = vrot.lane.b32.xlu1 %v1651_v1, %s1575_s27 }
  0x23   :  { %1369 = vmatprep.subr.mxu1 %v1751_v19 }
  0x24   :  { %1370 = vmatpush3.msra.mxu1 %v1751_v19 }
  0x25   :  { %1371 = vmatprep.subr.mxu1 %v1758_v20 }
  0x26   :  { %139 = vperm.xlu1 %1492, %v125_v3   ;;  %134 = vperm.xlu0 %1491, %v124_v4  }
  0x27   :  { %1372 = vmatpush3.msra.mxu1 %v1758_v20 }
  0x28   :  { %1373 = vmatprep.subr.mxu1 %v1765_v21 }
  0x29   :  { %1374 = vmatpush3.msra.mxu1 %v1765_v21 }
  0x2a   :  { %144 = vperm.xlu1 %1492, %v126_v7   ;;  %149 = vperm.xlu0 %1491, %v127_v8  }
  0x2b   :  { %1375 = vmatprep.subr.mxu1 %v1772_v22 }
  0x2c   :  { %1376 = vmatpush3.msra.mxu1 %v1772_v22 }
  0x2d   :  { %1377 = vmatprep.subr.mxu1 %v1779_v23 }
  0x2e   :  { %169 = vperm.xlu1 %1492, %v131_v11   ;;  %164 = vperm.xlu0 %1491, %v130_v12  }
  0x2f   :  { %1378 = vmatpush3.msra.mxu1 %v1779_v23 }
  0x30   :  { %1379 = vmatprep.subr.mxu1 %v1844_v61 }
  0x31   :  { %1380 = vmatpush3.msra.mxu1 %v1844_v61 }
  0x32   :  { %159 = vperm.xlu1 %1492, %v129_v15   ;;  %154 = vperm.xlu0 %1491, %v128_v16  }
  0x33   :  { %1381 = vmatprep.subr.mxu1 %v1851_v62 }
  0x34   :  { %1382 = vmatpush3.msra.mxu1 %v1851_v62 }
  0x35   :  { %1383 = vmatprep.subr.mxu1 %v1858_v63 }
  0x36   :  { %1384 = vmatpush3.msra.mxu1 %v1858_v63 }
  0x80   :  { %v109_v25 = vpop.permute.xlu0 %108  ;;  %v99_v26 = vpop.permute.xlu1 %98 }
  0x81   :  { %v115_v27 = vmul.f32 %v1785_v24, %v109_v25  ;;  %v105_v33 = vmul.f32 %v1788_v28, %v99_v26 }
  0x83   :  { %1315 = vmatprep.subr.mxu0 %v115_v27 }
  0x84   :  { %v107_v29 = vpop.permute.xlu0 %106  ;;  %1316 = vmatpush3.msra.mxu0 %v115_v27  ;;  %v97_v30 = vpop.permute.xlu1 %96 }
  0x85   :  { %v114_v31 = vmul.f32 %v1785_v24, %v107_v29  ;;  %v104_v34 = vmul.f32 %v1788_v28, %v97_v30 }
  0x87   :  { %1317 = vmatprep.subr.mxu0 %v114_v31 }
  0x88   :  { %1318 = vmatpush3.msra.mxu0 %v114_v31  ;;  %v89_v35 = vpop.permute.xlu0 %88  ;;  %v87_v36 = vpop.permute.xlu1 %86  ;;  %v407_v31 = vld [vmem:[%s2192_s6] sm:$0xff] }
  0x89   :  { %1319 = vmatprep.subr.mxu0 %v105_v33  ;;  %v95_v37 = vmul.f32 %v1791_v32, %v89_v35  ;;  %v94_v38 = vmul.f32 %v1791_v32, %v87_v36 }
  0x8a   :  { %1320 = vmatpush3.msra.mxu0 %v105_v33 }
  0x8b   :  { %1321 = vmatprep.subr.mxu0 %v104_v34 }
  0x8c   :  { %1322 = vmatpush3.msra.mxu0 %v104_v34  ;;  %v79_v39 = vpop.permute.xlu0 %78  ;;  %v77_v40 = vpop.permute.xlu1 %76 }
  0x8d   :  { %1323 = vmatprep.subr.mxu0 %v95_v37  ;;  %v85_v43 = vmul.f32 %v1797_v41, %v79_v39  ;;  %v84_v46 = vmul.f32 %v1797_v41, %v77_v40  ;;  %v410_v39 = vld [vmem:[%s2192_s6 + $0x18] sm:$0xff]  ;;  %v1908_v40 = vld [vmem:[%s2189_s3 + $0x8] sm:$0xff] }
  0x8e   :  { %1324 = vmatpush3.msra.mxu0 %v95_v37  ;;  %v408_v37 = vld [vmem:[%s2192_s6 + $0x8] sm:$0xff] }
  0x8f   :  { %1325 = vmatprep.subr.mxu0 %v94_v38 }
  0x90   :  { %1326 = vmatpush3.msra.mxu0 %v94_v38  ;;  %v69_v42 = vpop.permute.xlu0 %68  ;;  %v67_v45 = vpop.permute.xlu1 %66  ;;  %v409_v38 = vld [vmem:[%s2192_s6 + $0x10] sm:$0xff] }
  0x91   :  { %1327 = vmatprep.subr.mxu0 %v1642_v0  ;;  %v75_v47 = vmul.f32 %v1802_v44, %v69_v42  ;;  %v74_v50 = vmul.f32 %v1802_v44, %v67_v45  ;;  %v1913_v42 = vld [vmem:[%s2189_s3] sm:$0xff] }
  0x92   :  { %1328 = vmatpush3.msra.mxu0 %v1642_v0  ;;  %v1865_v0 = vld [vmem:[%s2188_s2] sm:$0xff] }
  0x93   :  { %1329 = vmatprep.subr.mxu0 %v1651_v1  ;;  %1385 = vmatprep.subr.mxu1 %v1865_v0 }
  0x94   :  { %1330 = vmatpush3.msra.mxu0 %v1651_v1  ;;  %v59_v48 = vpop.permute.xlu0 %58  ;;  %v57_v51 = vpop.permute.xlu1 %56  ;;  %1386 = vmatpush3.msra.mxu1 %v1865_v0 }
  0x95   :  { %1331 = vmatprep.subr.mxu0 %v85_v43  ;;  %v65_v52 = vmul.f32 %v1808_v49, %v59_v48  ;;  %v64_v53 = vmul.f32 %v1808_v49, %v57_v51 }
  0x96   :  { %1332 = vmatpush3.msra.mxu0 %v85_v43 }
  0x97   :  { %1333 = vmatprep.subr.mxu0 %v84_v46 }
  0x98   :  { %1334 = vmatpush3.msra.mxu0 %v84_v46 }
  0x99   :  { %1335 = vmatprep.subr.mxu0 %v75_v47 }
  0x9a   :  { %1336 = vmatpush3.msra.mxu0 %v75_v47 }
  0x9b   :  { %1337 = vmatprep.subr.mxu0 %v74_v50 }
  0x9c   :  { %1338 = vmatpush3.msra.mxu0 %v74_v50 }
  0x9d   :  { %1339 = vmatprep.subr.mxu0 %v65_v52 }
  0x9e   :  { %1340 = vmatpush3.msra.mxu0 %v65_v52 }
  0x9f   :  { %1341 = vmatprep.subr.mxu0 %v64_v53 }
  0xa0   :  { %1342 = vmatpush3.msra.mxu0 %v64_v53 }
  0xa1   :  { %1344 = vmatmul.mubr.msk.f32.vlgmr.msra.gmra.mxu0 %vm172_vm0, %v117_v54  ;;  %v135_v1 = vpop.permute.xlu0 %134  ;;  %v140_v2 = vpop.permute.xlu1 %139 }
  0xa2   :  { %1346 = vmatprep.mubr.msk.f32.mxu0 %vm172_vm0, %v118_v55 }
  0xa5   :  { %1347 = vmatmul.mubr.msk.f32.gmra.mxu0 %vm172_vm0, %v119_v56  ;;  %v150_v11 = vpop.permute.xlu0 %149  ;;  %v145_v15 = vpop.permute.xlu1 %144 }
  0xa6   :  { %1349 = vmatprep.mubr.msk.f32.mxu0 %vm172_vm0, %v120_v57 }
  0xa9   :  { %1350 = vmatmul.mubr.msk.f32.gmra.mxu0 %vm172_vm0, %v121_v58 }
  0xaa   :  { %1352 = vmatprep.mubr.msk.f32.mxu0 %vm172_vm0, %v122_v59 }
  0xad   :  { %1353 = vmatmul.mubr.msk.f32.gmra.mxu0 %vm172_vm0, %v123_v60 }
  0xae   :  { %1401 = vmatprep.mubr.msk.f32.mxu0 %vm411_vm1, %v407_v31 }
 0x161   :  { %v1345_v3 = vpop.f32.mrf.mxu0 }
 0x162   :  { %v1869_v4 = vadd.f32 %v1345_v3, %v140_v2 }
 0x163   :  { %v263_v5 = vpop.f32.mrf.mxu0 }
 0x164   :  { %v1871_v7 = vadd.f32 %v263_v5, %v135_v1  ;;  %v303_v16 = vmax.f32 %v1869_v4, 0.0 }
 0x165   :  { %v1348_v8 = vpop.f32.mrf.mxu0 }
 0x166   :  { %v302_v12 = vmax.f32 %v1871_v7, 0.0  ;;  %v1875_v25 = vadd.f32 %v1348_v8, %v150_v11 }
 0x167   :  { %v273_v26 = vpop.f32.mrf.mxu0 }
 0x168   :  { %v1877_v27 = vadd.f32 %v273_v26, %v145_v15  ;;  %1387 = vmatprep.mubr.f32.mxu1 %v302_v12  ;;  %v305_v30 = vmax.f32 %v1875_v25, 0.0 }
 0x169   :  { %1388 = vmatmul.mubr.f32.vlgmr.msra.gmra.mxu1 %v303_v16  ;;  %v1920_v43 = vpop.f32.mrf.mxu0 }
 0x16a   :  { %v304_v29 = vmax.f32 %v1877_v27, 0.0  ;;  %v721_v27 = vld [vmem:[%s2194_s8] sm:$0xff] }
 0x16b   :  { %v1922_v45 = vpop.f32.mrf.mxu0 }
 0x16c   :  { %1390 = vmatprep.mubr.f32.mxu1 %v304_v29 }
 0x16d   :  { %1391 = vmatmul.mubr.f32.gmra.mxu1 %v305_v30  ;;  %v1924_v46 = vpop.f32.mrf.mxu0 }
 0x16f   :  { %v1926_v47 = vpop.f32.mrf.mxu0 }
 0x229   :  { %v1389_v33 = vpop.f32.mrf.mxu1 }
 0x22b   :  { %v388_v34 = vpop.f32.mrf.mxu1 }
 0x22d   :  { %v1392_v35 = vpop.f32.mrf.mxu1 }
 0x22e   :  { %1393 = vmatprep.subr.mxu0 %v1392_v35 }
 0x22f   :  { %v398_v36 = vpop.f32.mrf.mxu1  ;;  %1394 = vmatpush3.msra.mxu0 %v1392_v35 }
 0x230   :  { %1395 = vmatprep.subr.mxu0 %v398_v36 }
 0x231   :  { %1396 = vmatpush3.msra.mxu0 %v398_v36 }
 0x232   :  { %1397 = vmatprep.subr.mxu0 %v1389_v33 }
 0x233   :  { %1398 = vmatpush3.msra.mxu0 %v1389_v33  ;;  %v724_v33 = vld [vmem:[%s2194_s8 + $0x18] sm:$0xff] }
 0x234   :  { %1399 = vmatprep.subr.mxu0 %v388_v34 }
 0x235   :  { %1400 = vmatpush3.msra.mxu0 %v388_v34 }
 0x236   :  { %1402 = vmatmul.mubr.msk.f32.vlgmr.msra.gmra.mxu0 %vm411_vm1, %v408_v37  ;;  %1407 = vmatprep.subr.mxu0 %v1908_v40 }
 0x237   :  { %1404 = vmatprep.mubr.msk.f32.mxu0 %vm411_vm1, %v409_v38  ;;  %1408 = vmatpush3.msra.mxu0 %v1908_v40 }
 0x238   :  { %1409 = vmatprep.subr.mxu0 %v1913_v42 }
 0x239   :  { %1410 = vmatpush3.msra.mxu0 %v1913_v42 }
 0x23a   :  { %1405 = vmatmul.mubr.msk.f32.gmra.mxu0 %vm411_vm1, %v410_v39  ;;  %1417 = vmatprep.subr.mxu0 %v1686_v6 }
 0x2f6   :  { %v1403_v48 = vpop.f32.mrf.mxu0 }
 0x2f7   :  { %v1202_v50 = vmul.f32 -1.442695, %v1403_v48 }
 0x2f8   :  { %v490_v51 = vpop.f32.mrf.mxu0 }
 0x2f9   :  { %1493 = vpow2.f32 %v1202_v50  ;;  %v1201_v52 = vmul.f32 -1.442695, %v490_v51 }
 0x2fa   :  { %v1406_v53 = vpop.f32.mrf.mxu0 }
 0x2fb   :  { %1495 = vpow2.f32 %v1201_v52  ;;  %v1204_v54 = vmul.f32 -1.442695, %v1406_v53 }
 0x2fc   :  { %v500_v55 = vpop.f32.mrf.mxu0 }
 0x2fd   :  { %1497 = vpow2.f32 %v1204_v54  ;;  %v1203_v56 = vmul.f32 -1.442695, %v500_v55 }
 0x2ff   :  { %1499 = vpow2.f32 %v1203_v56 }
 0x306   :  { %v1494_v57 = vpop.eup %1493 }
 0x307   :  { %v522_v59 = vadd.f32 1.0, %v1494_v57 }
 0x308   :  { %v1496_v58 = vpop.eup %1495 }
 0x309   :  { %v521_v60 = vadd.f32 1.0, %v1496_v58 }
 0x30a   :  { %v1498_v1 = vpop.eup %1497 }
 0x30b   :  { %1501 = vrcp.f32 %v521_v60  ;;  %v524_v3 = vadd.f32 1.0, %v1498_v1 }
 0x30c   :  { %v1500_v2 = vpop.eup %1499  ;;  %1503 = vrcp.f32 %v522_v59 }
 0x30d   :  { %v523_v5 = vadd.f32 1.0, %v1500_v2 }
 0x30f   :  { %1505 = vrcp.f32 %v523_v5 }
 0x310   :  { %1507 = vrcp.f32 %v524_v3 }
 0x318   :  { %v1502_v8 = vpop.eup %1501 }
 0x319   :  { %v1504_v11 = vpop.eup %1503  ;;  %1411 = vmatprep.mubr.msk.f32.mxu0 %vm535_vm2, %v1502_v8 }
 0x31a   :  { %1412 = vmatmul.mubr.msk.f32.vlgmr.msra.gmra.mxu0 %vm535_vm2, %v1504_v11 }
 0x31b   :  { %1418 = vmatpush3.msra.mxu0 %v1686_v6  ;;  %v1577_v6 = vmov 0.0  }
 0x31c   :  { %v1506_v15 = vpop.eup %1505  ;;  %1419 = vmatprep.subr.mxu0 %v1698_v9  ;;  %758 = vmatprep.subr.mxu1 %v1577_v6 }
 0x31d   :  { %v1508_v26 = vpop.eup %1507  ;;  %1414 = vmatprep.mubr.msk.f32.mxu0 %vm535_vm2, %v1506_v15  ;;  %1420 = vmatpush3.msra.mxu0 %v1698_v9 }
 0x31e   :  { %1415 = vmatmul.mubr.msk.f32.gmra.mxu0 %vm535_vm2, %v1508_v26  ;;  %1421 = vmatprep.subr.mxu0 %v1705_v10 }
 0x31f   :  { %1422 = vmatpush3.msra.mxu0 %v1705_v10  ;;  %v170_v10 = vpop.permute.xlu1 %169 }
 0x320   :  { %1423 = vmatprep.subr.mxu0 %v1718_v13 }
 0x321   :  { %1424 = vmatpush3.msra.mxu0 %v1718_v13 }
 0x322   :  { %1425 = vmatprep.subr.mxu0 %v1724_v14 }
 0x323   :  { %1426 = vmatpush3.msra.mxu0 %v1724_v14  ;;  %v165_v14 = vpop.permute.xlu0 %164 }
 0x324   :  { %1427 = vmatprep.subr.mxu0 %v1738_v17 }
 0x325   :  { %1428 = vmatpush3.msra.mxu0 %v1738_v17 }
 0x326   :  { %1429 = vmatprep.subr.mxu0 %v1744_v18 }
 0x327   :  { %1430 = vmatpush3.msra.mxu0 %v1744_v18  ;;  %v299_v18 = vadd.f32 %v1924_v46, %v170_v10  ;;  %v155_v4 = vpop.permute.xlu0 %154 }
 0x328   :  { %1431 = vmatprep.subr.mxu0 %v1751_v19 }
 0x329   :  { %1432 = vmatpush3.msra.mxu0 %v1751_v19 }
 0x32a   :  { %1433 = vmatprep.subr.mxu0 %v1758_v20 }
 0x32b   :  { %1434 = vmatpush3.msra.mxu0 %v1758_v20 }
 0x32c   :  { %1435 = vmatprep.subr.mxu0 %v1765_v21 }
 0x32d   :  { %1436 = vmatpush3.msra.mxu0 %v1765_v21  ;;  %v294_v21 = vadd.f32 %v1926_v47, %v165_v14 }
 0x32e   :  { %1437 = vmatprep.subr.mxu0 %v1772_v22 }
 0x32f   :  { %1438 = vmatpush3.msra.mxu0 %v1772_v22 }
 0x330   :  { %1439 = vmatprep.subr.mxu0 %v1779_v23 }
 0x331   :  { %1440 = vmatpush3.msra.mxu0 %v1779_v23 }
 0x332   :  { %1441 = vmatprep.subr.mxu0 %v1844_v61 }
 0x333   :  { %1442 = vmatpush3.msra.mxu0 %v1844_v61 }
 0x334   :  { %1443 = vmatprep.subr.mxu0 %v1851_v62 }
 0x335   :  { %1444 = vmatpush3.msra.mxu0 %v1851_v62  ;;  %v160_v62 = vpop.permute.xlu1 %159 }
 0x336   :  { %1445 = vmatprep.subr.mxu0 %v1858_v63 }
 0x337   :  { %1446 = vmatpush3.msra.mxu0 %v1858_v63  ;;  %v289_v63 = vadd.f32 %v1920_v43, %v160_v62 }
 0x338   :  { %1447 = vmatprep.subr.mxu0 %v1865_v0 }
 0x339   :  { %1448 = vmatpush3.msra.mxu0 %v1865_v0 }
 0x3da   :  { %v1413_v9 = vpop.f32.mrf.mxu0 }
 0x3db   :  { %v634_v22 = vmul.f32 %v1413_v9, %v303_v16  ;;  %v284_v16 = vadd.f32 %v1922_v45, %v155_v4  ;;  %v716_v4 = vld [vmem:[%s2193_s7 + $0x18] sm:$0xff] }
 0x3dc   :  { %v614_v13 = vpop.f32.mrf.mxu0 }
 0x3dd   :  { %v633_v0 = vmul.f32 %v614_v13, %v302_v12  ;;  %v1984_v25 = vadd.f32 %v634_v22, %v289_v63  ;;  %v714_v12 = vld [vmem:[%s2193_s7 + $0x8] sm:$0xff] }
 0x3de   :  { %v1416_v17 = vpop.f32.mrf.mxu0  ;;  %1209 = vmatprep.mubr.msk.f32.mxu1 %vm745_vm3, %v714_v12  ;;  %v720_v12 = vld [vmem:[%s2193_s7 + $0x38] sm:$0xff] }
 0x3df   :  { %v636_v19 = vmul.f32 %v1416_v17, %v305_v30  ;;  %v1990_v7 = vadd.f32 %v633_v0, %v284_v16  ;;  %v723_v30 = vld [vmem:[%s2194_s8 + $0x10] sm:$0xff]  ;;  %v713_v0 = vld [vmem:[%s2193_s7] sm:$0xff] }
 0x3e0   :  { %v624_v20 = vpop.f32.mrf.mxu0  ;;  %v715_v16 = vld [vmem:[%s2193_s7 + $0x10] sm:$0xff] }
 0x3e1   :  { %v1970_v23 = vadd.f32 %v636_v19, %v299_v18  ;;  %v635_v61 = vmul.f32 %v624_v20, %v304_v29  ;;  %v722_v29 = vld [vmem:[%s2194_s8 + $0x8] sm:$0xff] }
 0x3e3   :  { %v1977_v31 = vadd.f32 %v635_v61, %v294_v21  ;;  %671 = vrot.lane.b32.xlu1 %v1970_v23, %s1573_s24  ;;  %759 = vmatpush1.msra.mxu1 %v1970_v23 }
 0x3e4   :  { %760 = vmatprep.subr.mxu1 %v1577_v6 }
 0x3e5   :  { %669 = vrot.lane.b32.xlu0 %v1977_v31, %s1573_s24  ;;  %761 = vmatpush1.msra.mxu1 %v1977_v31 }
 0x3e6   :  { %762 = vmatprep.subr.mxu1 %v1577_v6 }
 0x3e7   :  { %667 = vrot.lane.b32.xlu1 %v1984_v25, %s1573_s24  ;;  %763 = vmatpush1.msra.mxu1 %v1984_v25 }
 0x3e8   :  { %764 = vmatprep.subr.mxu1 %v1577_v6 }
 0x3e9   :  { %665 = vrot.lane.b32.xlu0 %v1990_v7, %s1573_s24  ;;  %765 = vmatpush1.msra.mxu1 %v1990_v7 }
 0x3ea   :  { %766 = vmatprep.subr.mxu1 %v1577_v6 }
 0x3eb   :  { %659 = vrot.lane.b32.xlu1 %v1970_v23, %s1574_s0 }
 0x3ed   :  { %657 = vrot.lane.b32.xlu0 %v1977_v31, %s1574_s0 }
 0x3ef   :  { %655 = vrot.lane.b32.xlu1 %v1984_v25, %s1574_s0 }
 0x3f1   :  { %653 = vrot.lane.b32.xlu0 %v1990_v7, %s1574_s0 }
 0x3f3   :  { %647 = vrot.lane.b32.xlu1 %v1970_v23, %s1575_s27 }
 0x3f5   :  { %645 = vrot.lane.b32.xlu0 %v1977_v31, %s1575_s27 }
 0x3f7   :  { %643 = vrot.lane.b32.xlu1 %v1984_v25, %s1575_s27 }
 0x3f9   :  { %641 = vrot.lane.b32.xlu0 %v1990_v7, %s1575_s27 }
 0x3fb   :  { %707 = vrot.lane.b32.xlu1 %v1970_v23, %s1570_s20 }
 0x3fd   :  { %705 = vrot.lane.b32.xlu0 %v1977_v31, %s1570_s20 }
 0x3ff   :  { %703 = vrot.lane.b32.xlu1 %v1984_v25, %s1570_s20 }
 0x401   :  { %701 = vrot.lane.b32.xlu0 %v1990_v7, %s1570_s20 }
 0x403   :  { %695 = vrot.lane.b32.xlu1 %v1970_v23, %s1571_s21 }
 0x405   :  { %693 = vrot.lane.b32.xlu0 %v1977_v31, %s1571_s21 }
 0x407   :  { %691 = vrot.lane.b32.xlu1 %v1984_v25, %s1571_s21 }
 0x409   :  { %689 = vrot.lane.b32.xlu0 %v1990_v7, %s1571_s21 }
 0x40b   :  { %683 = vrot.lane.b32.xlu1 %v1970_v23, %s1572_s1 }
 0x40d   :  { %681 = vrot.lane.b32.xlu0 %v1977_v31, %s1572_s1 }
 0x40f   :  { %679 = vrot.lane.b32.xlu1 %v1984_v25, %s1572_s1 }
 0x411   :  { %677 = vrot.lane.b32.xlu0 %v1990_v7, %s1572_s1 }
 0x413   :  { %727 = vperm.xlu1 %1492, %v721_v27   ;;  %v719_v27 = vld [vmem:[%s2193_s7 + $0x30] sm:$0xff] }
 0x415   :  { %732 = vperm.xlu0 %1491, %v722_v29  }
 0x417   :  { %737 = vperm.xlu1 %1492, %v723_v30  }
 0x419   :  { %742 = vperm.xlu0 %1491, %v724_v33  }
 0x455   :  { %v672_v34 = vpop.permute.xlu1 %671 }
 0x456   :  { %v676_v35 = vmul.f32 %v1797_v41, %v672_v34 }
 0x457   :  { %v670_v36 = vpop.permute.xlu0 %669 }
 0x458   :  { %v675_v37 = vmul.f32 %v1797_v41, %v670_v36  ;;  %767 = vmatpush1.msra.mxu1 %v676_v35 }
 0x459   :  { %v668_v38 = vpop.permute.xlu1 %667  ;;  %768 = vmatprep.subr.mxu1 %v1577_v6 }
 0x45a   :  { %v674_v39 = vmul.f32 %v1797_v41, %v668_v38  ;;  %769 = vmatpush1.msra.mxu1 %v675_v37 }
 0x45b   :  { %v666_v43 = vpop.permute.xlu0 %665  ;;  %770 = vmatprep.subr.mxu1 %v1577_v6 }
 0x45c   :  { %v673_v45 = vmul.f32 %v1797_v41, %v666_v43  ;;  %771 = vmatpush1.msra.mxu1 %v674_v39 }
 0x45d   :  { %v660_v46 = vpop.permute.xlu1 %659  ;;  %772 = vmatprep.subr.mxu1 %v1577_v6 }
 0x45e   :  { %v664_v47 = vmul.f32 %v1802_v44, %v660_v46  ;;  %773 = vmatpush1.msra.mxu1 %v673_v45 }
 0x45f   :  { %v658_v48 = vpop.permute.xlu0 %657  ;;  %774 = vmatprep.subr.mxu1 %v1577_v6 }
 0x460   :  { %v663_v50 = vmul.f32 %v1802_v44, %v658_v48  ;;  %775 = vmatpush1.msra.mxu1 %v664_v47 }
 0x461   :  { %v656_v51 = vpop.permute.xlu1 %655  ;;  %776 = vmatprep.subr.mxu1 %v1577_v6 }
 0x462   :  { %v662_v52 = vmul.f32 %v1802_v44, %v656_v51  ;;  %777 = vmatpush1.msra.mxu1 %v663_v50 }
 0x463   :  { %v654_v41 = vpop.permute.xlu0 %653  ;;  %778 = vmatprep.subr.mxu1 %v1577_v6 }
 0x464   :  { %v661_v53 = vmul.f32 %v1802_v44, %v654_v41  ;;  %779 = vmatpush1.msra.mxu1 %v662_v52 }
 0x465   :  { %v648_v54 = vpop.permute.xlu1 %647  ;;  %780 = vmatprep.subr.mxu1 %v1577_v6 }
 0x466   :  { %v652_v55 = vmul.f32 %v1808_v49, %v648_v54  ;;  %781 = vmatpush1.msra.mxu1 %v661_v53 }
 0x467   :  { %v646_v56 = vpop.permute.xlu0 %645  ;;  %782 = vmatprep.subr.mxu1 %v1577_v6 }
 0x468   :  { %v651_v57 = vmul.f32 %v1808_v49, %v646_v56  ;;  %783 = vmatpush1.msra.mxu1 %v652_v55  ;;  %v932_v55 = vld [vmem:[%s2195_s9] sm:$0xff] }
 0x469   :  { %v644_v58 = vpop.permute.xlu1 %643  ;;  %784 = vmatprep.subr.mxu1 %v1577_v6 }
 0x46a   :  { %v650_v59 = vmul.f32 %v1808_v49, %v644_v58  ;;  %785 = vmatpush1.msra.mxu1 %v651_v57 }
 0x46b   :  { %v642_v44 = vpop.permute.xlu0 %641  ;;  %786 = vmatprep.subr.mxu1 %v1577_v6 }
 0x46c   :  { %v649_v60 = vmul.f32 %v1808_v49, %v642_v44  ;;  %787 = vmatpush1.msra.mxu1 %v650_v59  ;;  %v933_v44 = vld [vmem:[%s2195_s9 + $0x8] sm:$0xff] }
 0x46d   :  { %v708_v1 = vpop.permute.xlu1 %707  ;;  %788 = vmatprep.subr.mxu1 %v1577_v6 }
 0x46e   :  { %v712_v2 = vmul.f32 %v1785_v24, %v708_v1  ;;  %789 = vmatpush1.msra.mxu1 %v649_v60  ;;  %v934_v60 = vld [vmem:[%s2195_s9 + $0x10] sm:$0xff]  ;;  %v935_v1 = vld [vmem:[%s2195_s9 + $0x18] sm:$0xff]  ;;  %s1578_s9 = smov [#allocation5]  }
 0x46f   :  { %v706_v3 = vpop.permute.xlu0 %705  ;;  %798 = vmatprep.subr.mxu1 %v1577_v6  ;;  %s1171_s24 = sshll.u32 %s1578_s9, 4  ;;  %s1172_s24 = int_to_ptr.vmem [resolvable:$true] %s1171_s24 }
 0x470   :  { %v711_v5 = vmul.f32 %v1785_v24, %v706_v3  ;;  %799 = vmatpush2.msra.mxu1 %v712_v2  ;;  %s1545_s0 = scalar_lea.vmem %s1172_s24, 512  ;;  %p1550_p6 = scmp.lt.s32.totalorder %s1172_s24, %s1172_s24 }
 0x471   :  { %v704_v8 = vpop.permute.xlu1 %703  ;;  %800 = vmatprep.subr.mxu1 %v1577_v6  ;;  %p1546_p5 = scmp.ne.s32.totalorder %s1172_s24, %s1545_s0  ;;  %p1551_p7 = scmp.lt.s32.totalorder %s1545_s0, %s1545_s0 }
 0x472   :  { %v710_v11 = vmul.f32 %v1785_v24, %v704_v8  ;;  %801 = vmatpush2.msra.mxu1 %v711_v5 }
 0x473   :  { %v702_v49 = vpop.permute.xlu0 %701  ;;  %802 = vmatprep.subr.mxu1 %v1577_v6  ;;  %p1552_p8 = por %p1551_p7, %p1550_p6 }
 0x474   :  { %v709_v15 = vmul.f32 %v1785_v24, %v702_v49  ;;  %803 = vmatpush2.msra.mxu1 %v710_v11 }
 0x475   :  { %v696_v26 = vpop.permute.xlu1 %695  ;;  %804 = vmatprep.subr.mxu1 %v1577_v6  ;;  %p1553_p9 = pnand %p1552_p8, %p1546_p5 }
 0x476   :  { %v700_v9 = vmul.f32 %v1788_v28, %v696_v26  ;;  %805 = vmatpush2.msra.mxu1 %v709_v15 }
 0x477   :  { %v694_v10 = vpop.permute.xlu0 %693  ;;  %806 = vmatprep.subr.mxu1 %v1577_v6 }
 0x478   :  { %v699_v13 = vmul.f32 %v1788_v28, %v694_v10  ;;  %807 = vmatpush2.msra.mxu1 %v700_v9 }
 0x479   :  { %v692_v14 = vpop.permute.xlu1 %691  ;;  %808 = vmatprep.subr.mxu1 %v1577_v6 }
 0x47a   :  { %v698_v17 = vmul.f32 %v1788_v28, %v692_v14  ;;  %809 = vmatpush2.msra.mxu1 %v699_v13 }
 0x47b   :  { %v690_v24 = vpop.permute.xlu0 %689  ;;  %810 = vmatprep.subr.mxu1 %v1577_v6 }
 0x47c   :  { %v697_v18 = vmul.f32 %v1788_v28, %v690_v24  ;;  %811 = vmatpush2.msra.mxu1 %v698_v17 }
 0x47d   :  { %v684_v19 = vpop.permute.xlu1 %683  ;;  %812 = vmatprep.subr.mxu1 %v1577_v6 }
 0x47e   :  { %v688_v20 = vmul.f32 %v1791_v32, %v684_v19  ;;  %813 = vmatpush2.msra.mxu1 %v697_v18 }
 0x47f   :  { %v682_v21 = vpop.permute.xlu0 %681  ;;  %814 = vmatprep.subr.mxu1 %v1577_v6 }
 0x480   :  { %v687_v22 = vmul.f32 %v1791_v32, %v682_v21  ;;  %815 = vmatpush2.msra.mxu1 %v688_v20 }
 0x481   :  { %v680_v61 = vpop.permute.xlu1 %679  ;;  %816 = vmatprep.subr.mxu1 %v1577_v6 }
 0x482   :  { %v686_v62 = vmul.f32 %v1791_v32, %v680_v61  ;;  %817 = vmatpush2.msra.mxu1 %v687_v22 }
 0x483   :  { %v678_v28 = vpop.permute.xlu0 %677  ;;  %818 = vmatprep.subr.mxu1 %v1577_v6 }
 0x484   :  { %v685_v63 = vmul.f32 %v1791_v32, %v678_v28  ;;  %819 = vmatpush2.msra.mxu1 %v686_v62  ;;  %v718_v32 = vld [vmem:[%s2193_s7 + $0x28] sm:$0xff] }
 0x485   :  { %820 = vmatprep.subr.mxu1 %v1577_v6  ;;  %v717_v6 = vld [vmem:[%s2193_s7 + $0x20] sm:$0xff] }
 0x486   :  { %821 = vmatpush2.msra.mxu1 %v685_v63 }
 0x487   :  { %823 = vmatmul.mubr.f32.vlgmr.msra.gmra.mxu1 %v713_v0 }
 0x488   :  { %1210 = vmatprep.mubr.msk.f32.mxu1 %vm745_vm3, %v716_v4 }
 0x48b   :  { %828 = vmatmul.mubr.f32.gmra.mxu1 %v715_v16 }
 0x48c   :  { %1211 = vmatprep.mubr.msk.f32.mxu1 %vm745_vm3, %v718_v32 }
 0x48e   :  { %v728_v29 = vpop.permute.xlu1 %727 }
 0x48f   :  { %833 = vmatmul.mubr.f32.gmra.mxu1 %v717_v6 }
 0x490   :  { %1212 = vmatprep.mubr.msk.f32.mxu1 %vm745_vm3, %v720_v12  ;;  %v733_v36 = vpop.permute.xlu0 %732 }
 0x492   :  { %v738_v45 = vpop.permute.xlu1 %737 }
 0x493   :  { %838 = vmatmul.mubr.f32.gmra.mxu1 %v719_v27 }
 0x494   :  { %v743_v51 = vpop.permute.xlu0 %742 }
 0x547   :  { %v824_v30 = vpop.f32.mrf.mxu1 }
 0x548   :  { %v2127_v33 = vadd.f32 %v824_v30, %v728_v29 }
 0x549   :  { %v826_v34 = vpop.f32.mrf.mxu1 }
 0x54a   :  { %v843_v35 = vmax.f32 %v2127_v33, 0.0 }
 0x54b   :  { %v829_v37 = vpop.f32.mrf.mxu1 }
 0x54c   :  { %v2130_v38 = vadd.f32 %v829_v37, %v733_v36  ;;  %1449 = vmatprep.mubr.f32.mxu0 %v843_v35 }
 0x54d   :  { %v831_v39 = vpop.f32.mrf.mxu1 }
 0x54e   :  { %v844_v43 = vmax.f32 %v2130_v38, 0.0 }
 0x54f   :  { %v834_v46 = vpop.f32.mrf.mxu1 }
 0x550   :  { %v2135_v47 = vadd.f32 %v834_v46, %v738_v45  ;;  %1450 = vmatmul.mubr.f32.vlgmr.msra.gmra.mxu0 %v844_v43 }
 0x551   :  { %v836_v48 = vpop.f32.mrf.mxu1 }
 0x552   :  { %v845_v50 = vmax.f32 %v2135_v47, 0.0 }
 0x553   :  { %v839_v52 = vpop.f32.mrf.mxu1 }
 0x554   :  { %v2140_v41 = vadd.f32 %v839_v52, %v743_v51  ;;  %1452 = vmatprep.mubr.f32.mxu0 %v845_v50 }
 0x555   :  { %v841_v53 = vpop.f32.mrf.mxu1 }
 0x556   :  { %v846_v54 = vmax.f32 %v2140_v41, 0.0 }
 0x558   :  { %1453 = vmatmul.mubr.f32.gmra.mxu0 %v846_v54 }
 0x559   :  { %1463 = vmatprep.mubr.msk.f32.mxu0 %vm411_vm1, %v932_v55 }
 0x610   :  { %v1451_v56 = vpop.f32.mrf.mxu0 }
 0x612   :  { %v913_v57 = vpop.f32.mrf.mxu0 }
 0x618   :  { %v1454_v58 = vpop.f32.mrf.mxu0 }
 0x619   :  { %1455 = vmatprep.subr.mxu0 %v1454_v58 }
 0x61a   :  { %v923_v59 = vpop.f32.mrf.mxu0  ;;  %1456 = vmatpush3.msra.mxu0 %v1454_v58 }
 0x61b   :  { %1457 = vmatprep.subr.mxu0 %v923_v59 }
 0x61c   :  { %1458 = vmatpush3.msra.mxu0 %v923_v59 }
 0x61d   :  { %1459 = vmatprep.subr.mxu0 %v1451_v56 }
 0x61e   :  { %1460 = vmatpush3.msra.mxu0 %v1451_v56 }
 0x61f   :  { %1461 = vmatprep.subr.mxu0 %v913_v57 }
 0x620   :  { %1462 = vmatpush3.msra.mxu0 %v913_v57 }
 0x621   :  { %1464 = vmatmul.mubr.msk.f32.vlgmr.msra.gmra.mxu0 %vm411_vm1, %v933_v44  ;;  %1469 = vmatprep.subr.mxu0 %v1908_v40 }
 0x622   :  { %1466 = vmatprep.mubr.msk.f32.mxu0 %vm411_vm1, %v934_v60  ;;  %1470 = vmatpush3.msra.mxu0 %v1908_v40 }
 0x623   :  { %1471 = vmatprep.subr.mxu0 %v1913_v42 }
 0x624   :  { %1472 = vmatpush3.msra.mxu0 %v1913_v42 }
 0x625   :  { %1467 = vmatmul.mubr.msk.f32.gmra.mxu0 %vm411_vm1, %v935_v1 }
 0x6e1   :  { %v1465_v2 = vpop.f32.mrf.mxu0 }
 0x6e2   :  { %v1218_v3 = vmul.f32 -1.442695, %v1465_v2 }
 0x6e3   :  { %v1014_v5 = vpop.f32.mrf.mxu0 }
 0x6e4   :  { %1509 = vpow2.f32 %v1218_v3  ;;  %v1217_v8 = vmul.f32 -1.442695, %v1014_v5 }
 0x6e5   :  { %v1468_v11 = vpop.f32.mrf.mxu0 }
 0x6e6   :  { %1511 = vpow2.f32 %v1217_v8  ;;  %v1220_v49 = vmul.f32 -1.442695, %v1468_v11 }
 0x6e7   :  { %v1024_v15 = vpop.f32.mrf.mxu0 }
 0x6e8   :  { %1513 = vpow2.f32 %v1220_v49  ;;  %v1219_v26 = vmul.f32 -1.442695, %v1024_v15 }
 0x6ea   :  { %1515 = vpow2.f32 %v1219_v26 }
 0x6f1   :  { %v1510_v9 = vpop.eup %1509 }
 0x6f2   :  { %v1046_v10 = vadd.f32 1.0, %v1510_v9 }
 0x6f3   :  { %v1512_v40 = vpop.eup %1511 }
 0x6f4   :  { %v1045_v13 = vadd.f32 1.0, %v1512_v40 }
 0x6f5   :  { %v1514_v14 = vpop.eup %1513 }
 0x6f6   :  { %1517 = vrcp.f32 %v1045_v13  ;;  %v1048_v17 = vadd.f32 1.0, %v1514_v14 }
 0x6f7   :  { %v1516_v42 = vpop.eup %1515  ;;  %1519 = vrcp.f32 %v1046_v10 }
 0x6f8   :  { %v1047_v24 = vadd.f32 1.0, %v1516_v42 }
 0x6fa   :  { %1521 = vrcp.f32 %v1047_v24 }
 0x6fb   :  { %1523 = vrcp.f32 %v1048_v17 }
 0x703   :  { %v1518_v18 = vpop.eup %1517 }
 0x704   :  { %v1520_v19 = vpop.eup %1519  ;;  %1473 = vmatprep.mubr.msk.f32.mxu0 %vm535_vm2, %v1518_v18 }
 0x705   :  { %1474 = vmatmul.mubr.msk.f32.vlgmr.msra.gmra.mxu0 %vm535_vm2, %v1520_v19 }
 0x707   :  { %v1522_v20 = vpop.eup %1521 }
 0x708   :  { %v1524_v21 = vpop.eup %1523  ;;  %1476 = vmatprep.mubr.msk.f32.mxu0 %vm535_vm2, %v1522_v20 }
 0x709   :  { %1477 = vmatmul.mubr.msk.f32.gmra.mxu0 %vm535_vm2, %v1524_v21 }
 0x7c5   :  { %v1475_v22 = vpop.f32.mrf.mxu0 }
 0x7c6   :  { %v1155_v61 = vmul.f32 %v1475_v22, %v844_v43 }
 0x7c7   :  { %v1135_v62 = vpop.f32.mrf.mxu0 }
 0x7c8   :  { %v1159_v28 = vadd.f32 %v1155_v61, %v1984_v25  ;;  %v1154_v63 = vmul.f32 %v1135_v62, %v843_v35 }
 0x7c9   :  { %v1478_v0 = vpop.f32.mrf.mxu0 }
 0x7ca   :  { %1163 = vst [vmem:[#allocation5 + $0x8] sm:$0xff] %v1159_v28  ;;  %v1158_v4 = vadd.f32 %v1154_v63, %v1990_v7  ;;  %v1157_v16 = vmul.f32 %v1478_v0, %v846_v54 }
 0x7cb   :  { %v1145_v32 = vpop.f32.mrf.mxu0 }
 0x7cc   :  { %1162 = vst [vmem:[#allocation5] sm:$0xff] %v1158_v4  ;;  %v1161_v6 = vadd.f32 %v1157_v16, %v1970_v23  ;;  %v1156_v12 = vmul.f32 %v1145_v32, %v845_v50 }
 0x7ce   :  { %1165 = vst [vmem:[#allocation5 + $0x18] sm:$0xff] %v1161_v6  ;;  %v1160_v25 = vadd.f32 %v1156_v12, %v1977_v31 }
 0x7d0   :  { %1164 = vst [vmem:[#allocation5 + $0x10] sm:$0xff] %v1160_v25 }
 0x7d1   :  { %1556 = shalt.err (!%p1553_p9)
}
 0x7d2   :  { %s1579_s27 = smov 128   ;;  %s1580_s21 = smov 8  }
 0x7d3   :  { %1177 = dma.vmem_to_hbm [thread:$0]  %s1172_s24, 512, %s2196_s10, [#allocation4], %s1579_s27, %s1579_s27, %s1580_s21  }
 0x7d4   :  { %1567 = dma.done.wait [#allocation4], 512  }
 0x7d5   :  { %1568 = vsyncadd [#allocation4], 4294966784 }
 0x7d6   :  { %1181 = vsyncpa [#allocation3], 1 }
 0x7d7   :  { %1182 = vsyncpa [#allocation4], 1 }

</bundles_post_ra>
